<compile_context>
chip_gen: v7x
topology: tpu7x:2x2x1
jax: 0.10.0
libtpu: 0.0.40
codegen_flags: <defaults>
</compile_context>

<pallas_src>
import jax
import jax.numpy as jnp
from jax.experimental import pallas as pl
from jax.experimental.pallas import tpu as pltpu


def _round_up(x, m):
    return ((x + m - 1) // m) * m


def _tile_caps_for_device():
    """Generation-aware output-tile caps (tm_max, tn_max)."""
    try:
        kind = jax.devices()[0].device_kind.lower()
    except Exception:  # pragma: no cover - defensive; fall back to safe caps
        kind = ""
    if "v5 lite" in kind or "v5e" in kind or "v5lite" in kind:
        # v5e: 16 MiB default scoped VMEM and ~0.82 TB/s HBM -> ~4 MiB tiles.
        return 512, 2048
    # v6e (32 MiB scoped) and v7x (32 MiB scoped of 64 MiB physical,
    # 3.2 TB/s HBM -> per-step overhead is most expensive here): ~8 MiB tiles.
    return 512, 4096


def _vmem_step_bytes(tm, tn, F, in_itemsize):
    """Double-buffered per-step VMEM working set with (8,128) layout padding."""
    lane, sub = 128, 8
    uf_img = tm * _round_up(F, lane) * in_itemsize     # (tm, F) lane-padded
    itf_img = _round_up(F, sub) * tn * in_itemsize     # (F, tn) sublane-padded
    ib_img = sub * tn * 4                              # (1, tn) sublane-padded
    out_img = tm * tn * 4
    return 2 * (uf_img + itf_img + ib_img + out_img)


def _bmf_kernel(uf_ref, itf_t_ref, ib_ref, out_ref):
    # uf_ref:    (tm, F)  user-factor rows for this row tile
    # itf_t_ref: (F, tn)  item factors, pre-transposed (lane-dense along items)
    # ib_ref:    (1, tn)  item biases for this column stripe
    # out_ref:   (tm, tn)
    #
    # precision=HIGHEST: keep full f32 operand precision on the MXU (default
    # precision truncates f32 operands to bf16). Free: kernel is HBM-bound.
    linear = jnp.dot(uf_ref[...], itf_t_ref[...],
                     preferred_element_type=jnp.float32,
                     precision=jax.lax.Precision.HIGHEST)
    # biases = ones(U,1) @ ib.T  ==  broadcast of the (1, tn) bias over rows.
    out_ref[...] = (linear + ib_ref[...]).astype(out_ref.dtype)


def biased_mf_forward(users, items, user_factors, item_factors, item_biases,
                      *, factors_dtype=jnp.float32, out_dtype=jnp.float32,
                      tm_max=None, tn_max=None):
    """Pallas implementation of BiasedMatrixFactorization.forward.

    factors_dtype=jnp.bfloat16 halves input DMA bytes (accumulation stays f32)
    and out_dtype=jnp.bfloat16 halves the dominant output write; both default
    to float32 so the result matches the PyTorch module's f32 math.
    """
    # Embedding gathers (glue in plain JAX).
    uf = jnp.take(user_factors, users, axis=0).astype(factors_dtype)        # (U, F)
    itf_t = jnp.take(item_factors, items, axis=0).astype(factors_dtype).T   # (F, I)
    ib = jnp.take(item_biases, items, axis=0).astype(jnp.float32).T         # (1, I)

    U, F = uf.shape
    I = itf_t.shape[1]

    if tm_max is None or tn_max is None:
        dflt_tm, dflt_tn = _tile_caps_for_device()
        tm_max = dflt_tm if tm_max is None else tm_max
        tn_max = dflt_tn if tn_max is None else tn_max

    # Lane-dense tile sizes: tm multiple of 8 (sublane), tn multiple of 128 (lane).
    tm = min(tm_max, _round_up(U, 8))
    tn = min(tn_max, _round_up(I, 128))
    U_pad = _round_up(U, tm)
    I_pad = _round_up(I, tn)

    # Megacore (v7x has 2 TensorCores): if the caps would leave a (1,1) grid,
    # split the item axis so at least one "parallel" axis has >= 2 tiles.
    if U_pad // tm == 1 and I_pad // tn == 1 and I_pad % 256 == 0:
        tn = I_pad // 2

    # Zero-pad to tile multiples; padded rows/cols are sliced off at the end.
    if U_pad != U:
        uf = jnp.pad(uf, ((0, U_pad - U), (0, 0)))
    if I_pad != I:
        itf_t = jnp.pad(itf_t, ((0, 0), (0, I_pad - I)))
        ib = jnp.pad(ib, ((0, 0), (0, I_pad - I)))

    grid = (U_pad // tm, I_pad // tn)

    in_itemsize = jnp.dtype(factors_dtype).itemsize
    step_bytes = _vmem_step_bytes(tm, tn, F, in_itemsize)
    assert step_bytes <= 28 * 1024 * 1024, (
        "tile working set exceeds the safe scoped-VMEM budget; shrink tm/tn")
    # Explicit scoped-VMEM request: covers v5e's 16 MiB default when tiles are
    # large, and stays well under v7x's 64 MiB physical VMEM per TensorCore.
    vmem_limit = min(max(step_bytes + (2 << 20), 16 << 20), 30 << 20)

    cost = pl.CostEstimate(
        flops=2 * U_pad * I_pad * F,
        bytes_accessed=(U_pad * F + F * I_pad) * in_itemsize
                       + I_pad * 4 + U_pad * I_pad * jnp.dtype(out_dtype).itemsize,
        transcendentals=0,
    )

    out_padded = pl.pallas_call(
        _bmf_kernel,
        out_shape=jax.ShapeDtypeStruct((U_pad, I_pad), out_dtype),
        grid=grid,
        in_specs=[
            pl.BlockSpec((tm, F), lambda i, j: (i, 0)),   # user factors: row tiles
            pl.BlockSpec((F, tn), lambda i, j: (0, j)),   # item factors^T: column tiles
            pl.BlockSpec((1, tn), lambda i, j: (0, j)),   # item biases: column tiles
        ],
        out_specs=pl.BlockSpec((tm, tn), lambda i, j: (i, j)),
        compiler_params=pltpu.CompilerParams(
            dimension_semantics=("parallel", "parallel"),
            vmem_limit_bytes=int(vmem_limit),
        ),
        cost_estimate=cost,
    )(uf, itf_t, ib)

    return out_padded[:U, :I]


if __name__ == "__main__":
    # Small, deterministic synthetic setup consistent with the module's __init__.
    n_users, n_items, n_factors = 32, 48, 4
    U, I = 8, 16  # lengths of the `users` / `items` index vectors

    key = jax.random.PRNGKey(0)
    k_uf, k_if, k_ib, k_u, k_i = jax.random.split(key, 5)

    # torch.nn.Embedding default init is N(0, 1)
    user_factors = jax.random.normal(k_uf, (n_users, n_factors), dtype=jnp.float32)
    item_factors = jax.random.normal(k_if, (n_items, n_factors), dtype=jnp.float32)
    item_biases = jax.random.normal(k_ib, (n_items, 1), dtype=jnp.float32)

    users = jax.random.randint(k_u, (U,), 0, n_users, dtype=jnp.int32)
    items = jax.random.randint(k_i, (I,), 0, n_items, dtype=jnp.int32)

    out = biased_mf_forward(users, items, user_factors, item_factors, item_biases)
    out = jax.block_until_ready(out)

    # Pure-JAX reference (same semantics as the PyTorch forward), computed at
    # full f32 precision so it is comparable to the precision=HIGHEST kernel.
    uf_g = user_factors[users]
    itf_g = item_factors[items]
    ib_g = item_biases[items]
    linear_ref = jnp.einsum("uf,if->ui", uf_g, itf_g,
                            precision=jax.lax.Precision.HIGHEST)
    ref = ib_g.T + linear_ref  # == ones(U,1) @ ib_g.T + linear_ref

    assert out.shape == (U, I), out.shape
    assert jnp.allclose(out, ref, atol=1e-5, rtol=1e-5), "mismatch vs reference"

    print("KERNEL_OK")
</pallas_src>

<mosaic_0001>
module attributes {stable_mosaic.version = 11 : i64} {
  func.func @_bmf_kernel(%arg0: i32, %arg1: i32, %arg2: memref<8x4xf32, #tpu.memory_space<vmem>>, %arg3: memref<4x128xf32, #tpu.memory_space<vmem>>, %arg4: memref<1x128xf32, #tpu.memory_space<vmem>>, %arg5: memref<8x128xf32, #tpu.memory_space<vmem>>) attributes {dimension_semantics = [#tpu.dimension_semantics<parallel>, #tpu.dimension_semantics<parallel>], iteration_bounds = array<i64: 1, 1>, scalar_prefetch = 0 : i64, scratch_operands = 0 : i64, tpu.core_type = #tpu.core_type<tc>, window_params = [{transform_indices = @transform_0, window_bounds = array<i64: 8, 4>}, {transform_indices = @transform_1, window_bounds = array<i64: 4, 128>}, {transform_indices = @transform_2, window_bounds = array<i64: 1, 128>}, {transform_indices = @transform_3, window_bounds = array<i64: 8, 128>}]} {
    %c0 = arith.constant 0 : index
    %c0_0 = arith.constant 0 : index
    %0 = vector.load %arg2[%c0, %c0_0] : memref<8x4xf32, #tpu.memory_space<vmem>>, vector<8x4xf32>
    %c0_1 = arith.constant 0 : index
    %c0_2 = arith.constant 0 : index
    %1 = vector.load %arg3[%c0_1, %c0_2] : memref<4x128xf32, #tpu.memory_space<vmem>>, vector<4x128xf32>
    %cst = arith.constant dense<0.000000e+00> : vector<8x128xf32>
    %2 = tpu.matmul %0, %1, %cst {dimension_numbers = #tpu.dot_dimension_numbers<[1], [0], [0], [1], [0, 0, 1, 1], [], []>, precision = #tpu.contract_precision<fp32>} : vector<8x4xf32>, vector<4x128xf32>, vector<8x128xf32> -> vector<8x128xf32>
    %c0_3 = arith.constant 0 : index
    %c0_4 = arith.constant 0 : index
    %3 = vector.load %arg4[%c0_3, %c0_4] : memref<1x128xf32, #tpu.memory_space<vmem>>, vector<1x128xf32>
    %4 = vector.broadcast %3 : vector<1x128xf32> to vector<8x128xf32>
    %5 = arith.addf %2, %4 : vector<8x128xf32>
    %c0_5 = arith.constant 0 : index
    %c0_6 = arith.constant 0 : index
    %6 = vector.load %arg5[%c0_5, %c0_6] : memref<8x128xf32, #tpu.memory_space<vmem>>, vector<8x128xf32>
    tpu.vector_store %arg5[%c0_5, %c0_6], %5 {strides = array<i32>} : memref<8x128xf32, #tpu.memory_space<vmem>>, vector<8x128xf32>,
    return
  }
  func.func @transform_0(%arg0: i32, %arg1: i32) -> (i32, i32) {
    %c0_i32 = arith.constant 0 : i32
    %c0_i32_0 = arith.constant 0 : i32
    return %arg0, %c0_i32 : i32, i32
  }
  func.func @transform_1(%arg0: i32, %arg1: i32) -> (i32, i32) {
    %c0_i32 = arith.constant 0 : i32
    %c0_i32_0 = arith.constant 0 : i32
    return %c0_i32, %arg1 : i32, i32
  }
  func.func @transform_2(%arg0: i32, %arg1: i32) -> (i32, i32) {
    %c0_i32 = arith.constant 0 : i32
    %c0_i32_0 = arith.constant 0 : i32
    return %c0_i32, %arg1 : i32, i32
  }
  func.func @transform_3(%arg0: i32, %arg1: i32) -> (i32, i32) {
    %c0_i32 = arith.constant 0 : i32
    return %arg0, %arg1 : i32, i32
  }
}

</mosaic_0001>

<bundles_post_ra>
// kernel: tpu_custom_call.1
= control target key start
LH: loop header
LB: loop body
LE: loop exit
PB: predicated region body
PF: predicated region fallthrough
CT: control target
= control target key end

     0   :  { %vm28_vm0 = vcmask 1043456   ;;  %v573_v2 = vmov 0.0   ;;  %vm574_vm1 = vmmov 0   ;;  %vm24_vm2 = vcmask 31744   ;;  %s623_s0 = inlined_call_operand.vmem [shape: f32[8,4], index: 0, kind: input, shape index: {}]   ;;  %s624_s1 = inlined_call_operand.vmem [shape: f32[4,128], index: 1, kind: input, shape index: {}]   ;;  %s625_s2 = inlined_call_operand.vmem [shape: f32[1,128], index: 2, kind: input, shape index: {}]   ;;  %s626_s3 = inlined_call_operand.hbm [shape: f32[8,128], index: 3, kind: output, shape index: {}]  }
   0x1   :  { %v16_v0 = vld [vmem:[%s624_s1] sm:$0xf]  ;;  %521 = vmatprep.subr.mxu0 %v573_v2  ;;  %523 = vmatprep.mubr.msk.f32.mxu0 %vm574_vm1, %v573_v2 }
   0x2   :  { %v15_v1 = vld [vmem:[%s623_s0] sm:$0xff]  ;;  %v30_v3 = vsel %vm28_vm0, %v16_v0, 0 }
   0x3   :  { %8 = vsyncpa [#allocation3], 0  ;;  %v33_v4 = vand.u32 4294901760, %v30_v3  ;;  %v26_v5 = vsel %vm24_vm2, %v15_v1, 0  ;;  %506 = vmatprep.subr.mxu1 %v573_v2  ;;  %508 = vmatprep.mubr.msk.f32.mxu1 %vm574_vm1, %v573_v2  ;;  %v493_v17 = vld [vmem:[%s625_s2] ss:$0 sm:$0xff] }
   0x4   :  { %v98_v6 = vand.u32 4294901760, %v26_v5  ;;  %s575_s16 = smov [#allocation2]  }
   0x5   :  { %v110_v7 = vsub.f32 %v30_v3, %v33_v4  ;;  %522 = vmatpush3.msra.mxu0 %v33_v4  ;;  %507 = vmatpush3.msra.mxu1 %v33_v4  ;;  %s485_s17 = sshll.u32 %s575_s16, 4  ;;  %s486_s17 = int_to_ptr.vmem [resolvable:$true] %s485_s17 }
   0x6   :  { %v99_v8 = vsub.f32 %v26_v5, %v98_v6  ;;  %511 = vmatprep.subr.mxu1 %v573_v2  ;;  %526 = vmatprep.subr.mxu0 %v573_v2  ;;  %s549_s18 = scalar_lea.vmem %s486_s17, 128  ;;  %p554_p1 = scmp.lt.s32.totalorder %s486_s17, %s486_s17 }
   0x7   :  { %v111_v9 = vand.u32 4294901760, %v110_v7  ;;  %p550_p0 = scmp.ne.s32.totalorder %s486_s17, %s549_s18  ;;  %p555_p2 = scmp.lt.s32.totalorder %s549_s18, %s549_s18 }
   0x8   :  { %v100_v10 = vand.u32 4294901760, %v99_v8 }
   0x9   :  { %v112_v11 = vsub.f32 %v110_v7, %v111_v9  ;;  %p556_p3 = por %p555_p2, %p554_p1 }
   0xa   :  { %524 = vmatmul.mubr.f32.vlgmr.msra.gmra.mrb[0].mxu0 %v100_v10  ;;  %v101_v12 = vsub.f32 %v99_v8, %v100_v10 }
   0xb   :  { %v113_v13 = vand.u32 4294901760, %v112_v11  ;;  %527 = vmatpush3.msra.mxu0 %v111_v9  ;;  %528 = vmatprep.mubr.msk.f32.mxu0 %vm574_vm1, %v573_v2  ;;  %p557_p4 = pnand %p556_p3, %p550_p0 }
   0xc   :  { %v102_v14 = vand.u32 4294901760, %v101_v12  ;;  %531 = vmatprep.subr.mxu0 %v573_v2 }
   0xe   :  { %509 = vmatmul.mubr.f32.vlgmr.msra.gmra.mrb[0].mxu1 %v102_v14 }
   0xf   :  { %512 = vmatpush3.msra.mxu1 %v113_v13  ;;  %513 = vmatprep.mubr.msk.f32.mxu1 %vm574_vm1, %v573_v2 }
  0x10   :  { %516 = vmatprep.subr.mxu1 %v573_v2 }
  0x12   :  { %529 = vmatmul.mubr.f32.vlgmr.msra.gmra.mrb[0].mxu0 %v98_v6 }
  0x13   :  { %532 = vmatpush3.msra.mxu0 %v33_v4  ;;  %533 = vmatprep.mubr.msk.f32.mxu0 %vm574_vm1, %v573_v2 }
  0x16   :  { %514 = vmatmul.mubr.f32.vlgmr.msra.gmra.mrb[0].mxu1 %v98_v6 }
  0x17   :  { %517 = vmatpush3.msra.mxu1 %v110_v7  ;;  %518 = vmatprep.mubr.msk.f32.mxu1 %vm574_vm1, %v573_v2 }
  0x1a   :  { %534 = vmatmul.mubr.f32.vlgmr.msra.gmra.mrb[0].mxu0 %v98_v6 }
  0x1e   :  { %519 = vmatmul.mubr.f32.vlgmr.msra.gmra.mrb[0].mxu1 %v99_v8 }
  0xed   :  { %v474_v15 = vpop.f32.mrb[0].mxu0 }
  0xee   :  { %v535_v16 = vpop.f32.mrb[1].mxu0 }
  0xf1   :  { %v254_v18 = vpop.f32.mrb[0].mxu1 }
  0xf2   :  { %v536_v19 = vadd.f32 %v493_v17, %v254_v18  ;;  %v520_v20 = vpop.f32.mrb[1].mxu1 }
  0xf4   :  { %v537_v21 = vadd.f32 %v536_v19, %v474_v15 }
  0xf6   :  { %478 = vst [vmem:[#allocation2] sm:$0xff] %v537_v21 }
  0xf7   :  { %560 = shalt.err (!%p557_p4)
}
  0xf8   :  { %s561_s21 = scalar_lea.hbm %s626_s3, 128 }
  0xf9   :  { %p562_p5 = scmp.ne.s32.totalorder %s626_s3, %s561_s21  ;;  %p565_p6 = scmp.lt.u32.totalorder %s561_s21, %s626_s3 }
  0xfb   :  { %p567_p7 = pnand %p565_p6, %p562_p5 }
  0xfd   :  { %570 = shalt.err (!%p567_p7)
}
  0xfe   :  { %488 = dma.vmem_to_hbm [thread:$0]  %s486_s17, 128, %s626_s3, [#allocation3]  }
  0xff   :  { %571 = dma.done.wait [#allocation3], 128  }
 0x100   :  { %572 = vsyncadd [#allocation3], 4294967168 }
 0x101   :  { %492 = vsyncpa [#allocation3], 1 }

</bundles_post_ra>
